<compile_context>
chip_gen: v7x
topology: tpu7x:2x2x1
jax: 0.10.0
libtpu: 0.0.40
codegen_flags: <defaults>
</compile_context>

<pallas_src>
import functools

import jax
import jax.numpy as jnp
from jax.experimental import pallas as pl
from jax.experimental.pallas import tpu as pltpu

LANE = 128
DEFAULT_BLOCK_ROWS = 256


def _round_up(x, m):
    return ((x + m - 1) // m) * m


def _make_mlp_kernel(n_linear):
    """Build a fused MLP kernel: n_linear Linear layers with ReLU between."""

    def kernel(*refs):
        x_ref = refs[0]
        o_ref = refs[-1]
        wb_refs = refs[1:-1]

        h = x_ref[...]                                 # (tb, in_dim) f32
        for li in range(n_linear):
            w_ref = wb_refs[2 * li]
            b_ref = wb_refs[2 * li + 1]
            # bf16 inputs on the MXU, f32 accumulation; bias/ReLU in f32 (VPU).
            h = jnp.dot(h.astype(jnp.bfloat16), w_ref[...],
                        preferred_element_type=jnp.float32) + b_ref[...]
            if li < n_linear - 1:
                h = jnp.maximum(h, 0.0)
        o_ref[...] = h.astype(o_ref.dtype)             # lane-dense (tb, 128)

    return kernel


@functools.partial(jax.jit, static_argnames=("out_dim", "block_rows"))
def actor_forward(s, params, *, out_dim, block_rows=DEFAULT_BLOCK_ROWS):
    """JAX/Pallas equivalent of Actor.forward.

    s: (batch, *state_shape) float32
    params: tuple of (wT_bf16 (in_pad, out_pad), b_f32 (1, out_pad)) per layer
    returns (logits[:, :out_dim], None)
    """
    batch = s.shape[0]
    x = s.reshape(batch, -1).astype(jnp.float32)       # s.view(batch, -1)
    in_dim = x.shape[1]

    # Batch tile: multiple of 8 (f32 sublane); pad batch up to a tile multiple.
    if batch <= block_rows:
        tb = max(8, _round_up(batch, 8))
    else:
        tb = block_rows
    padded_batch = _round_up(batch, tb)
    if padded_batch != batch:
        x = jnp.pad(x, ((0, padded_batch - batch), (0, 0)))

    n_linear = len(params)
    feat_out = params[-1][0].shape[1]                  # lane-padded width (128)
    grid = (padded_batch // tb,)

    # Activations are tiled over the batch grid; weights/biases are
    # grid-invariant whole-array blocks -> resident in VMEM across the grid.
    in_specs = [pl.BlockSpec((tb, in_dim), lambda i: (i, 0),
                             memory_space=pltpu.VMEM)]
    flat_args = [x]
    for w, b in params:
        in_specs.append(pl.BlockSpec(w.shape, lambda i: (0, 0),
                                     memory_space=pltpu.VMEM))
        in_specs.append(pl.BlockSpec(b.shape, lambda i: (0, 0),
                                     memory_space=pltpu.VMEM))
        flat_args += [w, b]

    out_specs = pl.BlockSpec((tb, feat_out), lambda i: (i, 0),
                             memory_space=pltpu.VMEM)

    flops = 2 * padded_batch * sum(int(w.shape[0]) * int(w.shape[1])
                                   for w, _ in params)
    bytes_accessed = (x.size * x.dtype.itemsize
                      + sum(w.size * w.dtype.itemsize + b.size * b.dtype.itemsize
                            for w, b in params)
                      + padded_batch * feat_out * 4)

    logits_padded = pl.pallas_call(
        _make_mlp_kernel(n_linear),
        out_shape=jax.ShapeDtypeStruct((padded_batch, feat_out), jnp.float32),
        grid=grid,
        in_specs=in_specs,
        out_specs=out_specs,
        compiler_params=pltpu.CompilerParams(
            dimension_semantics=("parallel",)),
        cost_estimate=pl.CostEstimate(flops=flops,
                                      transcendentals=0,
                                      bytes_accessed=bytes_accessed),
    )(*flat_args)

    logits = logits_padded[:batch, :out_dim]
    return logits, None


def init_actor_params(key, state_dim, layer, action_dim):
    """nn.Linear-style init, lane-padded, kernel-ready.

    PyTorch stores W as (out, in); we store W^T as (in, out). Each layer's
    output dim is zero-padded to a multiple of 128 so every tile is lane-dense;
    the padded rows/cols are exactly zero, so the real outputs are unchanged.
    Weights are cast to bf16 (MXU fast path); biases stay f32.
    """
    dims = [state_dim] + list(layer) + [action_dim]
    padded = [state_dim] + [_round_up(d, LANE) for d in dims[1:]]
    params = []
    for i in range(len(dims) - 1):
        fan_in, fan_out = dims[i], dims[i + 1]
        pin, pout = padded[i], padded[i + 1]
        key, kw, kb = jax.random.split(key, 3)
        bound = 1.0 / float(fan_in) ** 0.5
        # nn.Linear default: U(-1/sqrt(fan_in), 1/sqrt(fan_in)) for W and b.
        w = jax.random.uniform(kw, (fan_in, fan_out), jnp.float32, -bound, bound)
        b = jax.random.uniform(kb, (fan_out,), jnp.float32, -bound, bound)
        w_pad = jnp.zeros((pin, pout), jnp.float32).at[:fan_in, :fan_out].set(w)
        b_pad = jnp.zeros((1, pout), jnp.float32).at[0, :fan_out].set(b)
        params.append((w_pad.astype(jnp.bfloat16), b_pad))
    return tuple(params)


def reference_forward(s, params, out_dim):
    """Pure-JAX emulation of the kernel math (bf16 operands, f32 accumulate)."""
    batch = s.shape[0]
    h = s.reshape(batch, -1).astype(jnp.float32)
    n = len(params)
    for i, (w, b) in enumerate(params):
        h = jnp.dot(h.astype(jnp.bfloat16).astype(jnp.float32),
                    w.astype(jnp.float32),
                    preferred_element_type=jnp.float32) + b
        if i < n - 1:
            h = jnp.maximum(h, 0.0)
    return h[:, :out_dim]


if __name__ == "__main__":
    key = jax.random.PRNGKey(0)

    # Small shapes consistent with the module:
    #   state_shape = (4, 8) -> flattened state dim = 32
    #   layer       = [64, 64, 32]
    #   action_shape = (8,)  -> output dim = 8
    # batch=500 is not a tile multiple -> exercises batch padding + 2-step grid.
    batch = 500
    state_shape = (4, 8)
    layer = [64, 64, 32]
    action_shape = (8,)
    action_range = (-1.0, 1.0)  # action_bias/scale are unused in forward()

    state_dim = 1
    for d in state_shape:
        state_dim *= d
    action_dim = 1
    for d in action_shape:
        action_dim *= d

    key, k_params, k_s = jax.random.split(key, 3)
    params = init_actor_params(k_params, state_dim, layer, action_dim)
    s = jax.random.normal(k_s, (batch,) + state_shape, jnp.float32)

    logits, extra = actor_forward(s, params, out_dim=action_dim)
    logits = jax.block_until_ready(logits)

    ref = reference_forward(s, params, action_dim)

    assert logits.shape == (batch, action_dim)
    assert extra is None
    assert bool(jnp.all(jnp.isfinite(logits)))
    # bf16 matmul inputs with f32 accumulation -> small tolerance vs f32 ref.
    assert jnp.allclose(logits, ref, atol=2e-3, rtol=2e-3), (
        float(jnp.max(jnp.abs(logits - ref))))

    print("KERNEL_OK")
</pallas_src>

<mosaic_0001>
module attributes {stable_mosaic.version = 11 : i64} {
  func.func @kernel(%arg0: i32, %arg1: memref<256x32xf32, #tpu.memory_space<vmem>>, %arg2: memref<32x128xbf16, #tpu.memory_space<vmem>>, %arg3: memref<1x128xf32, #tpu.memory_space<vmem>>, %arg4: memref<128x128xbf16, #tpu.memory_space<vmem>>, %arg5: memref<1x128xf32, #tpu.memory_space<vmem>>, %arg6: memref<128x128xbf16, #tpu.memory_space<vmem>>, %arg7: memref<1x128xf32, #tpu.memory_space<vmem>>, %arg8: memref<128x128xbf16, #tpu.memory_space<vmem>>, %arg9: memref<1x128xf32, #tpu.memory_space<vmem>>, %arg10: memref<256x128xf32, #tpu.memory_space<vmem>>) attributes {dimension_semantics = [#tpu.dimension_semantics<parallel>], iteration_bounds = array<i64: 2>, scalar_prefetch = 0 : i64, scratch_operands = 0 : i64, tpu.core_type = #tpu.core_type<tc>, window_params = [{transform_indices = @transform_0, window_bounds = array<i64: 256, 32>}, {pipeline_mode = #tpu.pipeline_mode<synchronous>, transform_indices = @transform_1, window_bounds = array<i64: 32, 128>}, {pipeline_mode = #tpu.pipeline_mode<synchronous>, transform_indices = @transform_2, window_bounds = array<i64: 1, 128>}, {pipeline_mode = #tpu.pipeline_mode<synchronous>, transform_indices = @transform_3, window_bounds = array<i64: 128, 128>}, {pipeline_mode = #tpu.pipeline_mode<synchronous>, transform_indices = @transform_4, window_bounds = array<i64: 1, 128>}, {pipeline_mode = #tpu.pipeline_mode<synchronous>, transform_indices = @transform_5, window_bounds = array<i64: 128, 128>}, {pipeline_mode = #tpu.pipeline_mode<synchronous>, transform_indices = @transform_6, window_bounds = array<i64: 1, 128>}, {pipeline_mode = #tpu.pipeline_mode<synchronous>, transform_indices = @transform_7, window_bounds = array<i64: 128, 128>}, {pipeline_mode = #tpu.pipeline_mode<synchronous>, transform_indices = @transform_8, window_bounds = array<i64: 1, 128>}, {transform_indices = @transform_9, window_bounds = array<i64: 256, 128>}]} {
    %c0 = arith.constant 0 : index
    %c0_0 = arith.constant 0 : index
    %0 = vector.load %arg1[%c0, %c0_0] : memref<256x32xf32, #tpu.memory_space<vmem>>, vector<256x32xf32>
    %1 = arith.truncf %0 : vector<256x32xf32> to vector<256x32xbf16>
    %c0_1 = arith.constant 0 : index
    %c0_2 = arith.constant 0 : index
    %2 = vector.load %arg2[%c0_1, %c0_2] : memref<32x128xbf16, #tpu.memory_space<vmem>>, vector<32x128xbf16>
    %cst = arith.constant dense<0.000000e+00> : vector<256x128xf32>
    %3 = tpu.matmul %1, %2, %cst {dimension_numbers = #tpu.dot_dimension_numbers<[1], [0], [0], [1], [0, 0, 1, 1], [], []>} : vector<256x32xbf16>, vector<32x128xbf16>, vector<256x128xf32> -> vector<256x128xf32>
    %c0_3 = arith.constant 0 : index
    %c0_4 = arith.constant 0 : index
    %4 = vector.load %arg3[%c0_3, %c0_4] : memref<1x128xf32, #tpu.memory_space<vmem>>, vector<1x128xf32>
    %5 = vector.broadcast %4 : vector<1x128xf32> to vector<256x128xf32>
    %6 = arith.addf %3, %5 : vector<256x128xf32>
    %cst_5 = arith.constant 0.000000e+00 : f32
    %7 = vector.broadcast %cst_5 : f32 to vector<256x128xf32>
    %8 = arith.maximumf %6, %7 : vector<256x128xf32>
    %9 = arith.truncf %8 : vector<256x128xf32> to vector<256x128xbf16>
    %c0_6 = arith.constant 0 : index
    %c0_7 = arith.constant 0 : index
    %10 = vector.load %arg4[%c0_6, %c0_7] : memref<128x128xbf16, #tpu.memory_space<vmem>>, vector<128x128xbf16>
    %cst_8 = arith.constant dense<0.000000e+00> : vector<256x128xf32>
    %11 = tpu.matmul %9, %10, %cst_8 {dimension_numbers = #tpu.dot_dimension_numbers<[1], [0], [0], [1], [0, 0, 1, 1], [], []>} : vector<256x128xbf16>, vector<128x128xbf16>, vector<256x128xf32> -> vector<256x128xf32>
    %c0_9 = arith.constant 0 : index
    %c0_10 = arith.constant 0 : index
    %12 = vector.load %arg5[%c0_9, %c0_10] : memref<1x128xf32, #tpu.memory_space<vmem>>, vector<1x128xf32>
    %13 = vector.broadcast %12 : vector<1x128xf32> to vector<256x128xf32>
    %14 = arith.addf %11, %13 : vector<256x128xf32>
    %cst_11 = arith.constant 0.000000e+00 : f32
    %15 = vector.broadcast %cst_11 : f32 to vector<256x128xf32>
    %16 = arith.maximumf %14, %15 : vector<256x128xf32>
    %17 = arith.truncf %16 : vector<256x128xf32> to vector<256x128xbf16>
    %c0_12 = arith.constant 0 : index
    %c0_13 = arith.constant 0 : index
    %18 = vector.load %arg6[%c0_12, %c0_13] : memref<128x128xbf16, #tpu.memory_space<vmem>>, vector<128x128xbf16>
    %cst_14 = arith.constant dense<0.000000e+00> : vector<256x128xf32>
    %19 = tpu.matmul %17, %18, %cst_14 {dimension_numbers = #tpu.dot_dimension_numbers<[1], [0], [0], [1], [0, 0, 1, 1], [], []>} : vector<256x128xbf16>, vector<128x128xbf16>, vector<256x128xf32> -> vector<256x128xf32>
    %c0_15 = arith.constant 0 : index
    %c0_16 = arith.constant 0 : index
    %20 = vector.load %arg7[%c0_15, %c0_16] : memref<1x128xf32, #tpu.memory_space<vmem>>, vector<1x128xf32>
    %21 = vector.broadcast %20 : vector<1x128xf32> to vector<256x128xf32>
    %22 = arith.addf %19, %21 : vector<256x128xf32>
    %cst_17 = arith.constant 0.000000e+00 : f32
    %23 = vector.broadcast %cst_17 : f32 to vector<256x128xf32>
    %24 = arith.maximumf %22, %23 : vector<256x128xf32>
    %25 = arith.truncf %24 : vector<256x128xf32> to vector<256x128xbf16>
    %c0_18 = arith.constant 0 : index
    %c0_19 = arith.constant 0 : index
    %26 = vector.load %arg8[%c0_18, %c0_19] : memref<128x128xbf16, #tpu.memory_space<vmem>>, vector<128x128xbf16>
    %cst_20 = arith.constant dense<0.000000e+00> : vector<256x128xf32>
    %27 = tpu.matmul %25, %26, %cst_20 {dimension_numbers = #tpu.dot_dimension_numbers<[1], [0], [0], [1], [0, 0, 1, 1], [], []>} : vector<256x128xbf16>, vector<128x128xbf16>, vector<256x128xf32> -> vector<256x128xf32>
    %c0_21 = arith.constant 0 : index
    %c0_22 = arith.constant 0 : index
    %28 = vector.load %arg9[%c0_21, %c0_22] : memref<1x128xf32, #tpu.memory_space<vmem>>, vector<1x128xf32>
    %29 = vector.broadcast %28 : vector<1x128xf32> to vector<256x128xf32>
    %30 = arith.addf %27, %29 : vector<256x128xf32>
    %c0_23 = arith.constant 0 : index
    %c0_24 = arith.constant 0 : index
    %31 = vector.load %arg10[%c0_23, %c0_24] : memref<256x128xf32, #tpu.memory_space<vmem>>, vector<256x128xf32>
    tpu.vector_store %arg10[%c0_23, %c0_24], %30 {strides = array<i32>} : memref<256x128xf32, #tpu.memory_space<vmem>>, vector<256x128xf32>,
    return
  }
  func.func @transform_0(%arg0: i32) -> (i32, i32) {
    %c0_i32 = arith.constant 0 : i32
    %c0_i32_0 = arith.constant 0 : i32
    return %arg0, %c0_i32 : i32, i32
  }
  func.func @transform_1(%arg0: i32) -> (i32, i32) {
    %c0_i32 = arith.constant 0 : i32
    %c0_i32_0 = arith.constant 0 : i32
    %c0_i32_1 = arith.constant 0 : i32
    return %c0_i32, %c0_i32_0 : i32, i32
  }
  func.func @transform_2(%arg0: i32) -> (i32, i32) {
    %c0_i32 = arith.constant 0 : i32
    %c0_i32_0 = arith.constant 0 : i32
    %c0_i32_1 = arith.constant 0 : i32
    return %c0_i32, %c0_i32_0 : i32, i32
  }
  func.func @transform_3(%arg0: i32) -> (i32, i32) {
    %c0_i32 = arith.constant 0 : i32
    %c0_i32_0 = arith.constant 0 : i32
    %c0_i32_1 = arith.constant 0 : i32
    return %c0_i32, %c0_i32_0 : i32, i32
  }
  func.func @transform_4(%arg0: i32) -> (i32, i32) {
    %c0_i32 = arith.constant 0 : i32
    %c0_i32_0 = arith.constant 0 : i32
    %c0_i32_1 = arith.constant 0 : i32
    return %c0_i32, %c0_i32_0 : i32, i32
  }
  func.func @transform_5(%arg0: i32) -> (i32, i32) {
    %c0_i32 = arith.constant 0 : i32
    %c0_i32_0 = arith.constant 0 : i32
    %c0_i32_1 = arith.constant 0 : i32
    return %c0_i32, %c0_i32_0 : i32, i32
  }
  func.func @transform_6(%arg0: i32) -> (i32, i32) {
    %c0_i32 = arith.constant 0 : i32
    %c0_i32_0 = arith.constant 0 : i32
    %c0_i32_1 = arith.constant 0 : i32
    return %c0_i32, %c0_i32_0 : i32, i32
  }
  func.func @transform_7(%arg0: i32) -> (i32, i32) {
    %c0_i32 = arith.constant 0 : i32
    %c0_i32_0 = arith.constant 0 : i32
    %c0_i32_1 = arith.constant 0 : i32
    return %c0_i32, %c0_i32_0 : i32, i32
  }
  func.func @transform_8(%arg0: i32) -> (i32, i32) {
    %c0_i32 = arith.constant 0 : i32
    %c0_i32_0 = arith.constant 0 : i32
    %c0_i32_1 = arith.constant 0 : i32
    return %c0_i32, %c0_i32_0 : i32, i32
  }
  func.func @transform_9(%arg0: i32) -> (i32, i32) {
    %c0_i32 = arith.constant 0 : i32
    %c0_i32_0 = arith.constant 0 : i32
    return %arg0, %c0_i32 : i32, i32
  }
}

</mosaic_0001>

<bundles_post_ra>
// kernel: actor_forward.1
= control target key start
LH: loop header
LB: loop body
LE: loop exit
PB: predicated region body
PF: predicated region fallthrough
CT: control target
= control target key end

     0   :  { %s1981_s30 = smov 0   ;;  %s2333_s0 = inlined_call_operand.vmem [shape: f32[512,32], index: 0, kind: input, shape index: {}]   ;;  %s2334_s1 = inlined_call_operand.vmem [shape: bf16[32,128], index: 1, kind: input, shape index: {}]   ;;  %s2335_s2 = inlined_call_operand.vmem [shape: f32[1,128], index: 2, kind: input, shape index: {}]   ;;  %s2336_s3 = inlined_call_operand.vmem [shape: bf16[128,128], index: 3, kind: input, shape index: {}]   ;;  %s2337_s4 = inlined_call_operand.vmem [shape: f32[1,128], index: 4, kind: input, shape index: {}]   ;;  %s2338_s5 = inlined_call_operand.vmem [shape: bf16[128,128], index: 5, kind: input, shape index: {}]   ;;  %s2339_s6 = inlined_call_operand.vmem [shape: f32[1,128], index: 6, kind: input, shape index: {}]   ;;  %s2340_s7 = inlined_call_operand.vmem [shape: bf16[128,128], index: 7, kind: input, shape index: {}]   ;;  %s2341_s8 = inlined_call_operand.vmem [shape: f32[1,128], index: 8, kind: input, shape index: {}]   ;;  %s2342_s9 = inlined_call_operand.vmem [shape: f32[512,128], index: 9, kind: output, shape index: {}]  }
   0x1 LB: > { %s1546_s10 = sadd.s32 4294967295, %s1929_s30   ;;  %p1550_p0 = scmp.ge.s32.totalorder %s1929_s30, 1  ;;  %s1929_s30 = sphi %s1981_s30, %s19_s30  }
   0x2   : > { %p288_p1 = scmp.lt.s32.totalorder %s1929_s30, 3 }
   0x4   : > { %p289_p2 = pnand %p1550_p0, %p288_p1 }
   0x5   : > { %v1897_v0 = vld [vmem:[%s2334_s1] sm:$0xff] (!%p289_p2)   ;;  %s1551_s13 = sshll.u32 (!%p289_p2), %s1546_s10, 5  ;;  %v1898_v1 = vld [vmem:[%s2334_s1 + $0x8] sm:$0xff] (!%p289_p2)   ;;  %v1901_v4 = vld [vmem:[%s2336_s3 + $0x10] sm:$0xff] (!%p289_p2)   ;;  %vm408_vm0 = vcmask (!%p289_p2), 261120  }
   0x6   : > { %292 = sbr.rel (%p289_p2) target bundleno = 960 (0x3c0), region = 56  ;;  %p325_p3 = scmp.lt.s32.totalorder (!%p289_p2), %s1551_s13, 63  ;;  %1693 = vmatprep.subr.bf16.mxu0 (!%p289_p2), %v1897_v0  ;;  %v1899_v2 = vld [vmem:[%s2336_s3] sm:$0xff] (!%p289_p2)   ;;  %v1900_v3 = vld [vmem:[%s2336_s3 + $0x8] sm:$0xff] (!%p289_p2)   ;;  %v1902_v14 = vld [vmem:[%s2336_s3 + $0x18] sm:$0xff] (!%p289_p2)  }
   0x7   : > { %1694 = vmatpush3.bf16.msra.mxu0 (!%p289_p2), %v1897_v0  ;;  %1729 = vmatprep.subr.bf16.mxu1 (!%p289_p2), %v1899_v2  ;;  %v1903_v19 = vld [vmem:[%s2336_s3 + $0x20] sm:$0xff] (!%p289_p2)   ;;  %v1904_v24 = vld [vmem:[%s2336_s3 + $0x28] sm:$0xff] (!%p289_p2)   ;;  %v1905_v56 = vld [vmem:[%s2336_s3 + $0x30] sm:$0xff] (!%p289_p2)  }
   0x8   : > { %1695 = vmatprep.subr.bf16.mxu0 (!%p289_p2), %v1898_v1  ;;  %1730 = vmatpush3.bf16.msra.mxu1 (!%p289_p2), %v1899_v2  ;;  %v1906_v57 = vld [vmem:[%s2336_s3 + $0x38] sm:$0xff] (!%p289_p2)   ;;  %v1907_v58 = vld [vmem:[%s2338_s5] sm:$0xff] (!%p289_p2)   ;;  %v1908_v59 = vld [vmem:[%s2338_s5 + $0x8] sm:$0xff] (!%p289_p2)  }
   0x9   : > { %1731 = vmatprep.subr.bf16.mxu1 (!%p289_p2), %v1900_v3  ;;  %v1909_v60 = vld [vmem:[%s2338_s5 + $0x10] sm:$0xff] (!%p289_p2)   ;;  %v1910_v61 = vld [vmem:[%s2338_s5 + $0x18] sm:$0xff] (!%p289_p2)   ;;  %v1911_v62 = vld [vmem:[%s2338_s5 + $0x20] sm:$0xff] (!%p289_p2)  }
   0xa   : > { %v1912_v63 = vld [vmem:[%s2338_s5 + $0x28] sm:$0xff] (!%p289_p2)   ;;  %v1913_v0 = vld [vmem:[%s2338_s5 + $0x30] sm:$0xff] (!%p289_p2)  }
   0xb   : > { %1696 = vmatpush3.bf16.msra.mxu0 (!%p289_p2), %v1898_v1  ;;  %v2101_v1 = vld [vmem:[%s2335_s2] ss:$0 sm:$0xff] (!%p289_p2) }
   0xc   : > { %1732 = vmatpush3.bf16.msra.mxu1 (!%p289_p2), %v1900_v3  ;;  %1777 = vmatprep.subr.bf16.mxu0 (!%p289_p2), %v1907_v58 }
   0xd   : > { %s2344_s13 = smov (!%p325_p3, %s1551_s13), 63  ;;  %1733 = vmatprep.subr.bf16.mxu1 %v1901_v4 }
   0xe   : > { %s1552_s20 = sshll.u32 %s2344_s13, 3 }
   0xf   : > { %s2009_s23 = scalar_lea.vmem %s2333_s0, %s1552_s20  ;;  %s2264_s24 = scalar_lea.vmem %s2342_s9, %s1552_s20 }
  0x10   : > { %v337_v5 = vld [vmem:[%s2009_s23] sm:$0xff]  ;;  %v338_v6 = vld [vmem:[%s2009_s23 + $0x8] sm:$0xff]  ;;  %v339_v7 = vld [vmem:[%s2009_s23 + $0x10] sm:$0xff]  ;;  %1734 = vmatpush3.bf16.msra.mxu1 %v1901_v4 }
  0x11   : > { %v369_v8 = vpack.c.bf16 %v338_v6, %v337_v5  ;;  %v340_v9 = vld [vmem:[%s2009_s23 + $0x18] sm:$0xff]  ;;  %v341_v10 = vld [vmem:[%s2009_s23 + $0x20] sm:$0xff]  ;;  %v342_v11 = vld [vmem:[%s2009_s23 + $0x28] sm:$0xff]  ;;  %1735 = vmatprep.subr.bf16.mxu1 %v1902_v14 }
  0x12   : > { %v370_v12 = vpack.c.bf16 %v340_v9, %v339_v7  ;;  %v371_v13 = vpack.c.bf16 %v342_v11, %v341_v10  ;;  %v343_v15 = vld [vmem:[%s2009_s23 + $0x30] sm:$0xff]  ;;  %v344_v16 = vld [vmem:[%s2009_s23 + $0x38] sm:$0xff]  ;;  %v345_v17 = vld [vmem:[%s2009_s23 + $0x40] sm:$0xff] }
  0x13   : > { %1697 = vmatprep.mubr.msk.bf16.mxu0 %vm408_vm0, %v369_v8  ;;  %v346_v18 = vld [vmem:[%s2009_s23 + $0x48] sm:$0xff]  ;;  %v372_v20 = vpack.c.bf16 %v344_v16, %v343_v15  ;;  %v347_v22 = vld [vmem:[%s2009_s23 + $0x50] sm:$0xff]  ;;  %v348_v23 = vld [vmem:[%s2009_s23 + $0x58] sm:$0xff] }
  0x14   : > { %1698 = vmatmul.mubr.msk.bf16.vlgmr.msra.gmra.mrb[0].mxu0 %vm408_vm0, %v370_v12  ;;  %v373_v21 = vpack.c.bf16 %v346_v18, %v345_v17  ;;  %1736 = vmatpush3.bf16.msra.mxu1 %v1902_v14  ;;  %v349_v25 = vld [vmem:[%s2009_s23 + $0x60] sm:$0xff]  ;;  %v350_v26 = vld [vmem:[%s2009_s23 + $0x68] sm:$0xff]  ;;  %v374_v27 = vpack.c.bf16 %v348_v23, %v347_v22  ;;  %v351_v29 = vld [vmem:[%s2009_s23 + $0x70] sm:$0xff] }
  0x15   : > { %1701 = vmatprep.mubr.msk.bf16.mxu0 %vm408_vm0, %v371_v13  ;;  %1737 = vmatprep.subr.bf16.mxu1 %v1903_v19  ;;  %v375_v28 = vpack.c.bf16 %v350_v26, %v349_v25  ;;  %v352_v30 = vld [vmem:[%s2009_s23 + $0x78] sm:$0xff]  ;;  %v353_v31 = vld [vmem:[%s2009_s23 + $0x80] sm:$0xff]  ;;  %v354_v32 = vld [vmem:[%s2009_s23 + $0x88] sm:$0xff] }
  0x16   : > { %v376_v33 = vpack.c.bf16 %v352_v30, %v351_v29  ;;  %v377_v34 = vpack.c.bf16 %v354_v32, %v353_v31  ;;  %v355_v35 = vld [vmem:[%s2009_s23 + $0x90] sm:$0xff]  ;;  %v356_v36 = vld [vmem:[%s2009_s23 + $0x98] sm:$0xff]  ;;  %v357_v37 = vld [vmem:[%s2009_s23 + $0xa0] sm:$0xff]  ;;  %1778 = vmatpush3.bf16.msra.mxu0 %v1907_v58 }
  0x17   : > { %v358_v38 = vld [vmem:[%s2009_s23 + $0xa8] sm:$0xff]  ;;  %v378_v39 = vpack.c.bf16 %v356_v36, %v355_v35  ;;  %v359_v41 = vld [vmem:[%s2009_s23 + $0xb0] sm:$0xff]  ;;  %v360_v42 = vld [vmem:[%s2009_s23 + $0xb8] sm:$0xff]  ;;  %1779 = vmatprep.subr.bf16.mxu0 %v1908_v59 }
  0x18   : > { %1738 = vmatpush3.bf16.msra.mxu1 %v1903_v19  ;;  %v379_v40 = vpack.c.bf16 %v358_v38, %v357_v37  ;;  %v361_v43 = vld [vmem:[%s2009_s23 + $0xc0] sm:$0xff]  ;;  %v362_v44 = vld [vmem:[%s2009_s23 + $0xc8] sm:$0xff]  ;;  %v380_v45 = vpack.c.bf16 %v360_v42, %v359_v41  ;;  %v363_v47 = vld [vmem:[%s2009_s23 + $0xd0] sm:$0xff] }
  0x19   : > { %1739 = vmatprep.subr.bf16.mxu1 %v1904_v24  ;;  %v381_v46 = vpack.c.bf16 %v362_v44, %v361_v43  ;;  %v364_v48 = vld [vmem:[%s2009_s23 + $0xd8] sm:$0xff]  ;;  %v365_v49 = vld [vmem:[%s2009_s23 + $0xe0] sm:$0xff]  ;;  %v366_v50 = vld [vmem:[%s2009_s23 + $0xe8] sm:$0xff] }
  0x1a   : > { %v382_v51 = vpack.c.bf16 %v364_v48, %v363_v47  ;;  %v383_v52 = vpack.c.bf16 %v366_v50, %v365_v49  ;;  %v367_v53 = vld [vmem:[%s2009_s23 + $0xf0] sm:$0xff]  ;;  %v368_v54 = vld [vmem:[%s2009_s23 + $0xf8] sm:$0xff]  ;;  %1780 = vmatpush3.bf16.msra.mxu0 %v1908_v59 }
  0x1b   : > { %v384_v55 = vpack.c.bf16 %v368_v54, %v367_v53  ;;  %1781 = vmatprep.subr.bf16.mxu0 %v1909_v60 }
  0x1c   : > { %1702 = vmatmul.mubr.msk.bf16.gmra.mrb[4].mxu0 %vm408_vm0, %v372_v20  ;;  %1740 = vmatpush3.bf16.msra.mxu1 %v1904_v24 }
  0x1d   : > { %1705 = vmatprep.mubr.msk.bf16.mxu0 %vm408_vm0, %v373_v21  ;;  %1741 = vmatprep.subr.bf16.mxu1 %v1905_v56 }
  0x1e   : > { %1782 = vmatpush3.bf16.msra.mxu0 %v1909_v60 }
  0x1f   : > { %1783 = vmatprep.subr.bf16.mxu0 %v1910_v61 }
  0x20   : > { %1742 = vmatpush3.bf16.msra.mxu1 %v1905_v56 }
  0x21   : > { %1743 = vmatprep.subr.bf16.mxu1 %v1906_v57 }
  0x22   : > { %1784 = vmatpush3.bf16.msra.mxu0 %v1910_v61 }
  0x23   : > { %1785 = vmatprep.subr.bf16.mxu0 %v1911_v62 }
  0x24   : > { %1706 = vmatmul.mubr.msk.bf16.gmra.mrb[8].mxu0 %vm408_vm0, %v374_v27  ;;  %1744 = vmatpush3.bf16.msra.mxu1 %v1906_v57 }
  0x25   : > { %1709 = vmatprep.mubr.msk.bf16.mxu0 %vm408_vm0, %v375_v28 }
  0x26   : > { %1786 = vmatpush3.bf16.msra.mxu0 %v1911_v62 }
  0x27   : > { %1787 = vmatprep.subr.bf16.mxu0 %v1912_v63 }
  0x2a   : > { %1788 = vmatpush3.bf16.msra.mxu0 %v1912_v63 }
  0x2b   : > { %1789 = vmatprep.subr.bf16.mxu0 %v1913_v0 }
  0x2c   : > { %1710 = vmatmul.mubr.msk.bf16.gmra.mrb[12].mxu0 %vm408_vm0, %v376_v33 }
  0x2d   : > { %1713 = vmatprep.mubr.msk.bf16.mxu0 %vm408_vm0, %v377_v34 }
  0x2e   : > { %1790 = vmatpush3.bf16.msra.mxu0 %v1913_v0 }
  0x34   : > { %1714 = vmatmul.mubr.msk.bf16.gmra.mrb[16].mxu0 %vm408_vm0, %v378_v39 }
  0x35   : > { %1717 = vmatprep.mubr.msk.bf16.mxu0 %vm408_vm0, %v379_v40 }
  0x3c   : > { %1718 = vmatmul.mubr.msk.bf16.gmra.mrb[20].mxu0 %vm408_vm0, %v380_v45 }
  0x3d   : > { %1721 = vmatprep.mubr.msk.bf16.mxu0 %vm408_vm0, %v381_v46 }
  0x44   : > { %1722 = vmatmul.mubr.msk.bf16.gmra.mrb[24].mxu0 %vm408_vm0, %v382_v51 }
  0x45   : > { %1725 = vmatprep.mubr.msk.bf16.mxu0 %vm408_vm0, %v383_v52 }
  0x4c   : > { %1726 = vmatmul.mubr.msk.bf16.gmra.mrb[28].mxu0 %vm408_vm0, %v384_v55 }
  0xe7   : > { %v1699_v2 = vpop.f32.mrb[0].mxu0 }
  0xe8   : > { %v500_v3 = vadd.f32 %v1699_v2, %v2101_v1  ;;  %v491_v4 = vpop.f32.mrb[1].mxu0 }
  0xe9   : > { %v492_v5 = vadd.f32 %v2101_v1, %v491_v4  ;;  %v1700_v6 = vpop.f32.mrb[2].mxu0 }
  0xea   : > { %v503_v7 = vadd.f32 %v1700_v6, %v2101_v1  ;;  %v494_v8 = vpop.f32.mrb[3].mxu0  ;;  %v620_v10 = vmax.f32 %v500_v3, 0.0 }
  0xeb   : > { %v495_v9 = vadd.f32 %v2101_v1, %v494_v8  ;;  %v618_v12 = vmax.f32 %v492_v5, 0.0 }
  0xec   : > { %v621_v11 = vmax.f32 %v503_v7, 0.0 }
  0xed   : > { %v619_v13 = vmax.f32 %v495_v9, 0.0 }
  0xee   : > { %v651_v14 = vpack.c.bf16 %v621_v11, %v620_v10 }
  0xef   : > { %v1703_v15 = vpop.f32.mrb[4].mxu0  ;;  %v650_v16 = vpack.c.bf16 %v619_v13, %v618_v12 }
  0xf0   : > { %v516_v17 = vadd.f32 %v1703_v15, %v2101_v1  ;;  %v507_v18 = vpop.f32.mrb[5].mxu0 }
  0xf1   : > { %v508_v19 = vadd.f32 %v2101_v1, %v507_v18  ;;  %v1704_v20 = vpop.f32.mrb[6].mxu0  ;;  %1745 = vmatprep.mubr.bf16.mxu1 %v650_v16 }
  0xf2   : > { %v519_v21 = vadd.f32 %v1704_v20, %v2101_v1  ;;  %v510_v22 = vpop.f32.mrb[7].mxu0  ;;  %1746 = vmatmul.mubr.bf16.vlgmr.msra.gmra.mrb[0].mxu1 %v651_v14  ;;  %v624_v24 = vmax.f32 %v516_v17, 0.0 }
  0xf3   : > { %v511_v23 = vadd.f32 %v2101_v1, %v510_v22  ;;  %v622_v26 = vmax.f32 %v508_v19, 0.0 }
  0xf4   : > { %v625_v25 = vmax.f32 %v519_v21, 0.0 }
  0xf5   : > { %v623_v27 = vmax.f32 %v511_v23, 0.0 }
  0xf6   : > { %v653_v28 = vpack.c.bf16 %v625_v25, %v624_v24 }
  0xf7   : > { %v652_v29 = vpack.c.bf16 %v623_v27, %v622_v26  ;;  %v1707_v30 = vpop.f32.mrb[8].mxu0 }
  0xf8   : > { %v532_v31 = vadd.f32 %v1707_v30, %v2101_v1  ;;  %v523_v32 = vpop.f32.mrb[9].mxu0 }
  0xf9   : > { %v524_v33 = vadd.f32 %v2101_v1, %v523_v32  ;;  %v1708_v34 = vpop.f32.mrb[10].mxu0  ;;  %1749 = vmatprep.mubr.bf16.mxu1 %v652_v29 }
  0xfa   : > { %v535_v35 = vadd.f32 %v1708_v34, %v2101_v1  ;;  %v526_v36 = vpop.f32.mrb[11].mxu0  ;;  %1750 = vmatmul.mubr.bf16.gmra.mrb[4].mxu1 %v653_v28  ;;  %v628_v38 = vmax.f32 %v532_v31, 0.0 }
  0xfb   : > { %v527_v37 = vadd.f32 %v2101_v1, %v526_v36  ;;  %v626_v40 = vmax.f32 %v524_v33, 0.0 }
  0xfc   : > { %v629_v39 = vmax.f32 %v535_v35, 0.0 }
  0xfd   : > { %v627_v41 = vmax.f32 %v527_v37, 0.0 }
  0xfe   : > { %v655_v42 = vpack.c.bf16 %v629_v39, %v628_v38 }
  0xff   : > { %v654_v43 = vpack.c.bf16 %v627_v41, %v626_v40  ;;  %v1711_v44 = vpop.f32.mrb[12].mxu0 }
 0x100   : > { %v548_v45 = vadd.f32 %v1711_v44, %v2101_v1  ;;  %v539_v46 = vpop.f32.mrb[13].mxu0 }
 0x101   : > { %v540_v47 = vadd.f32 %v2101_v1, %v539_v46  ;;  %v1712_v48 = vpop.f32.mrb[14].mxu0  ;;  %1753 = vmatprep.mubr.bf16.mxu1 %v654_v43 }
 0x102   : > { %v551_v49 = vadd.f32 %v1712_v48, %v2101_v1  ;;  %v542_v50 = vpop.f32.mrb[15].mxu0  ;;  %1754 = vmatmul.mubr.bf16.gmra.mrb[8].mxu1 %v655_v42  ;;  %v632_v52 = vmax.f32 %v548_v45, 0.0 }
 0x103   : > { %v543_v51 = vadd.f32 %v2101_v1, %v542_v50  ;;  %v630_v54 = vmax.f32 %v540_v47, 0.0 }
 0x104   : > { %v633_v53 = vmax.f32 %v551_v49, 0.0 }
 0x105   : > { %v631_v55 = vmax.f32 %v543_v51, 0.0  ;;  %v1914_v51 = vld [vmem:[%s2338_s5 + $0x38] sm:$0xff]  }
 0x106   : > { %v657_v56 = vpack.c.bf16 %v633_v53, %v632_v52  ;;  %1791 = vmatprep.subr.bf16.mxu0 %v1914_v51  ;;  %v1915_v52 = vld [vmem:[%s2340_s7] sm:$0xff]   ;;  %v1917_v53 = vld [vmem:[%s2340_s7 + $0x10] sm:$0xff]  }
 0x107   : > { %v656_v57 = vpack.c.bf16 %v631_v55, %v630_v54  ;;  %v1715_v58 = vpop.f32.mrb[16].mxu0  ;;  %1792 = vmatpush3.bf16.msra.mxu0 %v1914_v51  ;;  %1873 = vmatprep.subr.bf16.mxu1 %v1915_v52  ;;  %v2150_v54 = vld [vmem:[%s2340_s7 + $0x18] sm:$0xff]   ;;  %v2156_v55 = vld [vmem:[%s2340_s7 + $0x20] sm:$0xff]  }
 0x108   : > { %v564_v59 = vadd.f32 %v1715_v58, %v2101_v1  ;;  %v555_v60 = vpop.f32.mrb[17].mxu0  ;;  %1825 = vmatprep.subr.bf16.mxu0 %v1915_v52  ;;  %1881 = vmatpush3.bf16.msra.mxu1 %v1915_v52 }
 0x109   : > { %v556_v61 = vadd.f32 %v2101_v1, %v555_v60  ;;  %v1716_v62 = vpop.f32.mrb[18].mxu0  ;;  %1757 = vmatprep.mubr.bf16.mxu1 %v656_v57  ;;  %v2171_v57 = vld [vmem:[%s2337_s4] ss:$0 sm:$0xff] }
 0x10a   : > { %v567_v63 = vadd.f32 %v1716_v62, %v2101_v1  ;;  %v558_v0 = vpop.f32.mrb[19].mxu0  ;;  %1758 = vmatmul.mubr.bf16.gmra.mrb[12].mxu1 %v657_v56  ;;  %v636_v3 = vmax.f32 %v564_v59, 0.0  ;;  %v2163_v56 = vld [vmem:[%s2340_s7 + $0x28] sm:$0xff]  }
 0x10b   : > { %v559_v2 = vadd.f32 %v2101_v1, %v558_v0  ;;  %v634_v5 = vmax.f32 %v556_v61, 0.0 }
 0x10c   : > { %v637_v4 = vmax.f32 %v567_v63, 0.0 }
 0x10d   : > { %v635_v6 = vmax.f32 %v559_v2, 0.0 }
 0x10e   : > { %v659_v7 = vpack.c.bf16 %v637_v4, %v636_v3 }
 0x10f   : > { %v658_v8 = vpack.c.bf16 %v635_v6, %v634_v5  ;;  %v1719_v9 = vpop.f32.mrb[20].mxu0 }
 0x110   : > { %v580_v10 = vadd.f32 %v1719_v9, %v2101_v1  ;;  %v571_v11 = vpop.f32.mrb[21].mxu0 }
 0x111   : > { %v572_v12 = vadd.f32 %v2101_v1, %v571_v11  ;;  %v1720_v13 = vpop.f32.mrb[22].mxu0  ;;  %1761 = vmatprep.mubr.bf16.mxu1 %v658_v8 }
 0x112   : > { %v583_v14 = vadd.f32 %v1720_v13, %v2101_v1  ;;  %v574_v15 = vpop.f32.mrb[23].mxu0  ;;  %1762 = vmatmul.mubr.bf16.gmra.mrb[16].mxu1 %v659_v7  ;;  %v640_v17 = vmax.f32 %v580_v10, 0.0 }
 0x113   : > { %v575_v16 = vadd.f32 %v2101_v1, %v574_v15  ;;  %v638_v19 = vmax.f32 %v572_v12, 0.0 }
 0x114   : > { %v641_v18 = vmax.f32 %v583_v14, 0.0 }
 0x115   : > { %v639_v20 = vmax.f32 %v575_v16, 0.0 }
 0x116   : > { %v661_v21 = vpack.c.bf16 %v641_v18, %v640_v17 }
 0x117   : > { %v660_v22 = vpack.c.bf16 %v639_v20, %v638_v19  ;;  %v1723_v23 = vpop.f32.mrb[24].mxu0 }
 0x118   : > { %v596_v24 = vadd.f32 %v1723_v23, %v2101_v1  ;;  %v587_v25 = vpop.f32.mrb[25].mxu0 }
 0x119   : > { %v588_v26 = vadd.f32 %v2101_v1, %v587_v25  ;;  %v1724_v27 = vpop.f32.mrb[26].mxu0  ;;  %1765 = vmatprep.mubr.bf16.mxu1 %v660_v22 }
 0x11a   : > { %v599_v28 = vadd.f32 %v1724_v27, %v2101_v1  ;;  %v590_v29 = vpop.f32.mrb[27].mxu0  ;;  %1766 = vmatmul.mubr.bf16.gmra.mrb[20].mxu1 %v661_v21  ;;  %v644_v31 = vmax.f32 %v596_v24, 0.0 }
 0x11b   : > { %v591_v30 = vadd.f32 %v2101_v1, %v590_v29  ;;  %v642_v33 = vmax.f32 %v588_v26, 0.0 }
 0x11c   : > { %v645_v32 = vmax.f32 %v599_v28, 0.0 }
 0x11d   : > { %v643_v34 = vmax.f32 %v591_v30, 0.0 }
 0x11e   : > { %v663_v35 = vpack.c.bf16 %v645_v32, %v644_v31 }
 0x11f   : > { %v662_v36 = vpack.c.bf16 %v643_v34, %v642_v33  ;;  %v1727_v37 = vpop.f32.mrb[28].mxu0 }
 0x120   : > { %v612_v38 = vadd.f32 %v1727_v37, %v2101_v1  ;;  %v603_v39 = vpop.f32.mrb[29].mxu0 }
 0x121   : > { %v604_v40 = vadd.f32 %v2101_v1, %v603_v39  ;;  %v1728_v41 = vpop.f32.mrb[30].mxu0  ;;  %1769 = vmatprep.mubr.bf16.mxu1 %v662_v36 }
 0x122   : > { %v615_v42 = vadd.f32 %v1728_v41, %v2101_v1  ;;  %v606_v43 = vpop.f32.mrb[31].mxu0  ;;  %1770 = vmatmul.mubr.bf16.gmra.mrb[24].mxu1 %v663_v35  ;;  %v648_v45 = vmax.f32 %v612_v38, 0.0 }
 0x123   : > { %v607_v44 = vadd.f32 %v2101_v1, %v606_v43  ;;  %v646_v47 = vmax.f32 %v604_v40, 0.0  ;;  %v1916_v1 = vld [vmem:[%s2340_s7 + $0x8] sm:$0xff]  }
 0x124   : > { %v649_v46 = vmax.f32 %v615_v42, 0.0  ;;  %1874 = vmatprep.subr.bf16.mxu1 %v1916_v1 }
 0x125   : > { %v647_v48 = vmax.f32 %v607_v44, 0.0  ;;  %1882 = vmatpush3.bf16.msra.mxu1 %v1916_v1 }
 0x126   : > { %v665_v49 = vpack.c.bf16 %v649_v46, %v648_v45  ;;  %1875 = vmatprep.subr.bf16.mxu1 %v1917_v53 }
 0x127   : > { %v664_v50 = vpack.c.bf16 %v647_v48, %v646_v47 }
 0x129   : > { %1773 = vmatprep.mubr.bf16.mxu1 %v664_v50  ;;  %1883 = vmatpush3.bf16.msra.mxu1 %v1917_v53 }
 0x12a   : > { %1774 = vmatmul.mubr.bf16.gmra.mrb[28].mxu1 %v665_v49  ;;  %1876 = vmatprep.subr.bf16.mxu1 %v2150_v54 }
 0x12d   : > { %1884 = vmatpush3.bf16.msra.mxu1 %v2150_v54 }
 0x12e   : > { %1877 = vmatprep.subr.bf16.mxu1 %v2156_v55 }
 0x131   : > { %1885 = vmatpush3.bf16.msra.mxu1 %v2156_v55 }
 0x132   : > { %1878 = vmatprep.subr.bf16.mxu1 %v2163_v56 }
 0x135   : > { %1886 = vmatpush3.bf16.msra.mxu1 %v2163_v56 }
 0x1c5   : > { %v1747_v58 = vpop.f32.mrb[0].mxu1 }
 0x1c6   : > { %v780_v59 = vadd.f32 %v1747_v58, %v2171_v57  ;;  %v771_v60 = vpop.f32.mrb[1].mxu1 }
 0x1c7   : > { %v772_v61 = vadd.f32 %v2171_v57, %v771_v60  ;;  %v1748_v62 = vpop.f32.mrb[2].mxu1 }
 0x1c8   : > { %v783_v63 = vadd.f32 %v1748_v62, %v2171_v57  ;;  %v774_v0 = vpop.f32.mrb[3].mxu1  ;;  %v900_v3 = vmax.f32 %v780_v59, 0.0 }
 0x1c9   : > { %v775_v2 = vadd.f32 %v2171_v57, %v774_v0  ;;  %v898_v5 = vmax.f32 %v772_v61, 0.0 }
 0x1ca   : > { %v901_v4 = vmax.f32 %v783_v63, 0.0 }
 0x1cb   : > { %v899_v6 = vmax.f32 %v775_v2, 0.0 }
 0x1cc   : > { %v931_v7 = vpack.c.bf16 %v901_v4, %v900_v3 }
 0x1cd   : > { %v930_v8 = vpack.c.bf16 %v899_v6, %v898_v5  ;;  %v1751_v9 = vpop.f32.mrb[4].mxu1 }
 0x1ce   : > { %v796_v10 = vadd.f32 %v1751_v9, %v2171_v57  ;;  %v787_v11 = vpop.f32.mrb[5].mxu1 }
 0x1cf   : > { %v788_v12 = vadd.f32 %v2171_v57, %v787_v11  ;;  %v1752_v13 = vpop.f32.mrb[6].mxu1  ;;  %1793 = vmatprep.mubr.bf16.mxu0 %v930_v8 }
 0x1d0   : > { %v799_v14 = vadd.f32 %v1752_v13, %v2171_v57  ;;  %v790_v15 = vpop.f32.mrb[7].mxu1  ;;  %1794 = vmatmul.mubr.bf16.vlgmr.msra.gmra.mrb[32].mxu0 %v931_v7  ;;  %v904_v17 = vmax.f32 %v796_v10, 0.0 }
 0x1d1   : > { %v791_v16 = vadd.f32 %v2171_v57, %v790_v15  ;;  %1826 = vmatpush3.bf16.msra.mxu0 %v1915_v52  ;;  %v902_v19 = vmax.f32 %v788_v12, 0.0 }
 0x1d2   : > { %v905_v18 = vmax.f32 %v799_v14, 0.0  ;;  %1827 = vmatprep.subr.bf16.mxu0 %v1916_v1 }
 0x1d3   : > { %v903_v20 = vmax.f32 %v791_v16, 0.0 }
 0x1d4   : > { %v933_v21 = vpack.c.bf16 %v905_v18, %v904_v17 }
 0x1d5   : > { %v932_v22 = vpack.c.bf16 %v903_v20, %v902_v19  ;;  %v1755_v23 = vpop.f32.mrb[8].mxu1  ;;  %1828 = vmatpush3.bf16.msra.mxu0 %v1916_v1 }
 0x1d6   : > { %v812_v24 = vadd.f32 %v1755_v23, %v2171_v57  ;;  %v803_v25 = vpop.f32.mrb[9].mxu1  ;;  %1829 = vmatprep.subr.bf16.mxu0 %v1917_v53 }
 0x1d7   : > { %v804_v26 = vadd.f32 %v2171_v57, %v803_v25  ;;  %v1756_v27 = vpop.f32.mrb[10].mxu1  ;;  %1797 = vmatprep.mubr.bf16.mxu0 %v932_v22 }
 0x1d8   : > { %v815_v28 = vadd.f32 %v1756_v27, %v2171_v57  ;;  %v806_v29 = vpop.f32.mrb[11].mxu1  ;;  %1798 = vmatmul.mubr.bf16.gmra.mrb[36].mxu0 %v933_v21  ;;  %v908_v31 = vmax.f32 %v812_v24, 0.0 }
 0x1d9   : > { %v807_v30 = vadd.f32 %v2171_v57, %v806_v29  ;;  %1830 = vmatpush3.bf16.msra.mxu0 %v1917_v53  ;;  %v906_v33 = vmax.f32 %v804_v26, 0.0 }
 0x1da   : > { %v909_v32 = vmax.f32 %v815_v28, 0.0  ;;  %1831 = vmatprep.subr.bf16.mxu0 %v2150_v54 }
 0x1db   : > { %v907_v34 = vmax.f32 %v807_v30, 0.0 }
 0x1dc   : > { %v935_v35 = vpack.c.bf16 %v909_v32, %v908_v31 }
 0x1dd   : > { %v934_v36 = vpack.c.bf16 %v907_v34, %v906_v33  ;;  %v1759_v37 = vpop.f32.mrb[12].mxu1  ;;  %1832 = vmatpush3.bf16.msra.mxu0 %v2150_v54 }
 0x1de   : > { %v828_v38 = vadd.f32 %v1759_v37, %v2171_v57  ;;  %v819_v39 = vpop.f32.mrb[13].mxu1  ;;  %1833 = vmatprep.subr.bf16.mxu0 %v2156_v55 }
 0x1df   : > { %v820_v40 = vadd.f32 %v2171_v57, %v819_v39  ;;  %v1760_v41 = vpop.f32.mrb[14].mxu1  ;;  %1801 = vmatprep.mubr.bf16.mxu0 %v934_v36 }
 0x1e0   : > { %v831_v42 = vadd.f32 %v1760_v41, %v2171_v57  ;;  %v822_v43 = vpop.f32.mrb[15].mxu1  ;;  %1802 = vmatmul.mubr.bf16.gmra.mrb[40].mxu0 %v935_v35  ;;  %v912_v45 = vmax.f32 %v828_v38, 0.0 }
 0x1e1   : > { %v823_v44 = vadd.f32 %v2171_v57, %v822_v43  ;;  %1834 = vmatpush3.bf16.msra.mxu0 %v2156_v55  ;;  %v910_v47 = vmax.f32 %v820_v40, 0.0 }
 0x1e2   : > { %v913_v46 = vmax.f32 %v831_v42, 0.0  ;;  %1835 = vmatprep.subr.bf16.mxu0 %v2163_v56 }
 0x1e3   : > { %v911_v48 = vmax.f32 %v823_v44, 0.0  ;;  %v1921_v44 = vld [vmem:[%s2340_s7 + $0x30] sm:$0xff]  }
 0x1e4   : > { %v937_v49 = vpack.c.bf16 %v913_v46, %v912_v45  ;;  %1879 = vmatprep.subr.bf16.mxu1 %v1921_v44  ;;  %v2220_v45 = vld [vmem:[%s2339_s6] ss:$0 sm:$0xff] }
 0x1e5   : > { %v936_v50 = vpack.c.bf16 %v911_v48, %v910_v47  ;;  %v1763_v51 = vpop.f32.mrb[16].mxu1  ;;  %1836 = vmatpush3.bf16.msra.mxu0 %v2163_v56  ;;  %1887 = vmatpush3.bf16.msra.mxu1 %v1921_v44 }
 0x1e6   : > { %v844_v52 = vadd.f32 %v1763_v51, %v2171_v57  ;;  %v835_v1 = vpop.f32.mrb[17].mxu1  ;;  %1837 = vmatprep.subr.bf16.mxu0 %v1921_v44 }
 0x1e7   : > { %v836_v53 = vadd.f32 %v2171_v57, %v835_v1  ;;  %v1764_v54 = vpop.f32.mrb[18].mxu1  ;;  %1805 = vmatprep.mubr.bf16.mxu0 %v936_v50 }
 0x1e8   : > { %v847_v55 = vadd.f32 %v1764_v54, %v2171_v57  ;;  %v838_v58 = vpop.f32.mrb[19].mxu1  ;;  %1806 = vmatmul.mubr.bf16.gmra.mrb[44].mxu0 %v937_v49  ;;  %v916_v60 = vmax.f32 %v844_v52, 0.0 }
 0x1e9   : > { %v839_v59 = vadd.f32 %v2171_v57, %v838_v58  ;;  %v914_v62 = vmax.f32 %v836_v53, 0.0  ;;  %1838 = vmatpush3.bf16.msra.mxu0 %v1921_v44 }
 0x1ea   : > { %v917_v61 = vmax.f32 %v847_v55, 0.0 }
 0x1eb   : > { %v915_v63 = vmax.f32 %v839_v59, 0.0 }
 0x1ec   : > { %v939_v0 = vpack.c.bf16 %v917_v61, %v916_v60 }
 0x1ed   : > { %v938_v2 = vpack.c.bf16 %v915_v63, %v914_v62  ;;  %v1767_v56 = vpop.f32.mrb[20].mxu1 }
 0x1ee   : > { %v860_v3 = vadd.f32 %v1767_v56, %v2171_v57  ;;  %v851_v4 = vpop.f32.mrb[21].mxu1 }
 0x1ef   : > { %v852_v5 = vadd.f32 %v2171_v57, %v851_v4  ;;  %v1768_v6 = vpop.f32.mrb[22].mxu1  ;;  %1809 = vmatprep.mubr.bf16.mxu0 %v938_v2 }
 0x1f0   : > { %v863_v7 = vadd.f32 %v1768_v6, %v2171_v57  ;;  %v854_v8 = vpop.f32.mrb[23].mxu1  ;;  %1810 = vmatmul.mubr.bf16.gmra.mrb[48].mxu0 %v939_v0  ;;  %v920_v10 = vmax.f32 %v860_v3, 0.0 }
 0x1f1   : > { %v855_v9 = vadd.f32 %v2171_v57, %v854_v8  ;;  %v918_v12 = vmax.f32 %v852_v5, 0.0 }
 0x1f2   : > { %v921_v11 = vmax.f32 %v863_v7, 0.0 }
 0x1f3   : > { %v919_v13 = vmax.f32 %v855_v9, 0.0 }
 0x1f4   : > { %v941_v14 = vpack.c.bf16 %v921_v11, %v920_v10 }
 0x1f5   : > { %v940_v15 = vpack.c.bf16 %v919_v13, %v918_v12  ;;  %v1771_v16 = vpop.f32.mrb[24].mxu1 }
 0x1f6   : > { %v876_v17 = vadd.f32 %v1771_v16, %v2171_v57  ;;  %v867_v18 = vpop.f32.mrb[25].mxu1 }
 0x1f7   : > { %v868_v19 = vadd.f32 %v2171_v57, %v867_v18  ;;  %v1772_v20 = vpop.f32.mrb[26].mxu1  ;;  %1813 = vmatprep.mubr.bf16.mxu0 %v940_v15 }
 0x1f8   : > { %v879_v21 = vadd.f32 %v1772_v20, %v2171_v57  ;;  %v870_v22 = vpop.f32.mrb[27].mxu1  ;;  %1814 = vmatmul.mubr.bf16.gmra.mrb[52].mxu0 %v941_v14  ;;  %v924_v24 = vmax.f32 %v876_v17, 0.0 }
 0x1f9   : > { %v871_v23 = vadd.f32 %v2171_v57, %v870_v22  ;;  %v922_v26 = vmax.f32 %v868_v19, 0.0 }
 0x1fa   : > { %v925_v25 = vmax.f32 %v879_v21, 0.0 }
 0x1fb   : > { %v923_v27 = vmax.f32 %v871_v23, 0.0 }
 0x1fc   : > { %v943_v28 = vpack.c.bf16 %v925_v25, %v924_v24 }
 0x1fd   : > { %v942_v29 = vpack.c.bf16 %v923_v27, %v922_v26  ;;  %v1775_v30 = vpop.f32.mrb[28].mxu1 }
 0x1fe   : > { %v892_v31 = vadd.f32 %v1775_v30, %v2171_v57  ;;  %v883_v32 = vpop.f32.mrb[29].mxu1 }
 0x1ff   : > { %v884_v33 = vadd.f32 %v2171_v57, %v883_v32  ;;  %v1776_v34 = vpop.f32.mrb[30].mxu1  ;;  %1817 = vmatprep.mubr.bf16.mxu0 %v942_v29 }
 0x200   : > { %v895_v35 = vadd.f32 %v1776_v34, %v2171_v57  ;;  %v886_v36 = vpop.f32.mrb[31].mxu1  ;;  %1818 = vmatmul.mubr.bf16.gmra.mrb[56].mxu0 %v943_v28  ;;  %v928_v38 = vmax.f32 %v892_v31, 0.0 }
 0x201   : > { %v887_v37 = vadd.f32 %v2171_v57, %v886_v36  ;;  %v926_v40 = vmax.f32 %v884_v33, 0.0  ;;  %v1922_v57 = vld [vmem:[%s2340_s7 + $0x38] sm:$0xff]  }
 0x202   : > { %v929_v39 = vmax.f32 %v895_v35, 0.0  ;;  %1839 = vmatprep.subr.bf16.mxu0 %v1922_v57  ;;  %1880 = vmatprep.subr.bf16.mxu1 %v1922_v57 }
 0x203   : > { %v927_v41 = vmax.f32 %v887_v37, 0.0  ;;  %1840 = vmatpush3.bf16.msra.mxu0 %v1922_v57  ;;  %1888 = vmatpush3.bf16.msra.mxu1 %v1922_v57 }
 0x204   : > { %v945_v42 = vpack.c.bf16 %v929_v39, %v928_v38 }
 0x205   : > { %v944_v43 = vpack.c.bf16 %v927_v41, %v926_v40 }
 0x207   : > { %1821 = vmatprep.mubr.bf16.mxu0 %v944_v43 }
 0x208   : > { %1822 = vmatmul.mubr.bf16.gmra.mrb[60].mxu0 %v945_v42 }
 0x2a3   : > { %v1795_v46 = vpop.f32.mrb[32].mxu0 }
 0x2a4   : > { %v1060_v47 = vadd.f32 %v1795_v46, %v2220_v45  ;;  %v1051_v48 = vpop.f32.mrb[33].mxu0 }
 0x2a5   : > { %v1052_v49 = vadd.f32 %v2220_v45, %v1051_v48  ;;  %v1796_v50 = vpop.f32.mrb[34].mxu0 }
 0x2a6   : > { %v1063_v51 = vadd.f32 %v1796_v50, %v2220_v45  ;;  %v1054_v52 = vpop.f32.mrb[35].mxu0  ;;  %v1180_v53 = vmax.f32 %v1060_v47, 0.0 }
 0x2a7   : > { %v1055_v1 = vadd.f32 %v2220_v45, %v1054_v52  ;;  %v1178_v55 = vmax.f32 %v1052_v49, 0.0 }
 0x2a8   : > { %v1181_v54 = vmax.f32 %v1063_v51, 0.0 }
 0x2a9   : > { %v1179_v58 = vmax.f32 %v1055_v1, 0.0 }
 0x2aa   : > { %v1211_v59 = vpack.c.bf16 %v1181_v54, %v1180_v53 }
 0x2ab   : > { %v1210_v60 = vpack.c.bf16 %v1179_v58, %v1178_v55  ;;  %v1799_v61 = vpop.f32.mrb[36].mxu0 }
 0x2ac   : > { %v1076_v62 = vadd.f32 %v1799_v61, %v2220_v45  ;;  %v1067_v63 = vpop.f32.mrb[37].mxu0 }
 0x2ad   : > { %v1068_v0 = vadd.f32 %v2220_v45, %v1067_v63  ;;  %v1800_v2 = vpop.f32.mrb[38].mxu0  ;;  %1841 = vmatprep.mubr.bf16.mxu0 %v1210_v60 }
 0x2ae   : > { %v1079_v56 = vadd.f32 %v1800_v2, %v2220_v45  ;;  %v1070_v3 = vpop.f32.mrb[39].mxu0  ;;  %1842 = vmatmul.mubr.bf16.vlgmr.msra.gmra.mrb[64].mxu0 %v1211_v59  ;;  %v1184_v5 = vmax.f32 %v1076_v62, 0.0 }
 0x2af   : > { %v1071_v4 = vadd.f32 %v2220_v45, %v1070_v3  ;;  %v1182_v7 = vmax.f32 %v1068_v0, 0.0 }
 0x2b0   : > { %v1185_v6 = vmax.f32 %v1079_v56, 0.0 }
 0x2b1   : > { %v1183_v8 = vmax.f32 %v1071_v4, 0.0 }
 0x2b2   : > { %v1213_v9 = vpack.c.bf16 %v1185_v6, %v1184_v5 }
 0x2b3   : > { %v1212_v10 = vpack.c.bf16 %v1183_v8, %v1182_v7  ;;  %v1803_v11 = vpop.f32.mrb[40].mxu0 }
 0x2b4   : > { %v1092_v12 = vadd.f32 %v1803_v11, %v2220_v45  ;;  %v1083_v13 = vpop.f32.mrb[41].mxu0 }
 0x2b5   : > { %v1084_v14 = vadd.f32 %v2220_v45, %v1083_v13  ;;  %v1804_v15 = vpop.f32.mrb[42].mxu0  ;;  %1845 = vmatprep.mubr.bf16.mxu1 %v1212_v10 }
 0x2b6   : > { %v1095_v16 = vadd.f32 %v1804_v15, %v2220_v45  ;;  %v1086_v17 = vpop.f32.mrb[43].mxu0  ;;  %1846 = vmatmul.mubr.bf16.vlgmr.msra.gmra.mrb[32].mxu1 %v1213_v9  ;;  %v1188_v19 = vmax.f32 %v1092_v12, 0.0 }
 0x2b7   : > { %v1087_v18 = vadd.f32 %v2220_v45, %v1086_v17  ;;  %v1186_v21 = vmax.f32 %v1084_v14, 0.0 }
 0x2b8   : > { %v1189_v20 = vmax.f32 %v1095_v16, 0.0 }
 0x2b9   : > { %v1187_v22 = vmax.f32 %v1087_v18, 0.0 }
 0x2ba   : > { %v1215_v23 = vpack.c.bf16 %v1189_v20, %v1188_v19 }
 0x2bb   : > { %v1214_v24 = vpack.c.bf16 %v1187_v22, %v1186_v21  ;;  %v1807_v25 = vpop.f32.mrb[44].mxu0 }
 0x2bc   : > { %v1108_v26 = vadd.f32 %v1807_v25, %v2220_v45  ;;  %v1099_v27 = vpop.f32.mrb[45].mxu0 }
 0x2bd   : > { %v1100_v28 = vadd.f32 %v2220_v45, %v1099_v27  ;;  %v1808_v29 = vpop.f32.mrb[46].mxu0  ;;  %1849 = vmatprep.mubr.bf16.mxu1 %v1214_v24 }
 0x2be   : > { %v1111_v30 = vadd.f32 %v1808_v29, %v2220_v45  ;;  %v1102_v31 = vpop.f32.mrb[47].mxu0  ;;  %1850 = vmatmul.mubr.bf16.gmra.mrb[36].mxu1 %v1215_v23  ;;  %v1192_v33 = vmax.f32 %v1108_v26, 0.0 }
 0x2bf   : > { %v1103_v32 = vadd.f32 %v2220_v45, %v1102_v31  ;;  %v1190_v35 = vmax.f32 %v1100_v28, 0.0 }
 0x2c0   : > { %v1193_v34 = vmax.f32 %v1111_v30, 0.0 }
 0x2c1   : > { %v1191_v36 = vmax.f32 %v1103_v32, 0.0  ;;  %v2257_v32 = vld [vmem:[%s2341_s8] ss:$0 sm:$0xff] }
 0x2c2   : > { %v1217_v37 = vpack.c.bf16 %v1193_v34, %v1192_v33 }
 0x2c3   : > { %v1216_v38 = vpack.c.bf16 %v1191_v36, %v1190_v35  ;;  %v1811_v39 = vpop.f32.mrb[48].mxu0 }
 0x2c4   : > { %v1124_v40 = vadd.f32 %v1811_v39, %v2220_v45  ;;  %v1115_v41 = vpop.f32.mrb[49].mxu0 }
 0x2c5   : > { %v1116_v42 = vadd.f32 %v2220_v45, %v1115_v41  ;;  %v1812_v43 = vpop.f32.mrb[50].mxu0  ;;  %1853 = vmatprep.mubr.bf16.mxu1 %v1216_v38 }
 0x2c6   : > { %v1127_v44 = vadd.f32 %v1812_v43, %v2220_v45  ;;  %v1118_v57 = vpop.f32.mrb[51].mxu0  ;;  %1854 = vmatmul.mubr.bf16.gmra.mrb[40].mxu1 %v1217_v37  ;;  %v1196_v47 = vmax.f32 %v1124_v40, 0.0 }
 0x2c7   : > { %v1119_v46 = vadd.f32 %v2220_v45, %v1118_v57  ;;  %v1194_v49 = vmax.f32 %v1116_v42, 0.0 }
 0x2c8   : > { %v1197_v48 = vmax.f32 %v1127_v44, 0.0 }
 0x2c9   : > { %v1195_v50 = vmax.f32 %v1119_v46, 0.0 }
 0x2ca   : > { %v1219_v51 = vpack.c.bf16 %v1197_v48, %v1196_v47 }
 0x2cb   : > { %v1218_v52 = vpack.c.bf16 %v1195_v50, %v1194_v49  ;;  %v1815_v1 = vpop.f32.mrb[52].mxu0 }
 0x2cc   : > { %v1140_v53 = vadd.f32 %v1815_v1, %v2220_v45  ;;  %v1131_v54 = vpop.f32.mrb[53].mxu0 }
 0x2cd   : > { %v1132_v55 = vadd.f32 %v2220_v45, %v1131_v54  ;;  %v1816_v58 = vpop.f32.mrb[54].mxu0  ;;  %1857 = vmatprep.mubr.bf16.mxu1 %v1218_v52 }
 0x2ce   : > { %v1143_v59 = vadd.f32 %v1816_v58, %v2220_v45  ;;  %v1134_v60 = vpop.f32.mrb[55].mxu0  ;;  %1858 = vmatmul.mubr.bf16.gmra.mrb[44].mxu1 %v1219_v51  ;;  %v1200_v62 = vmax.f32 %v1140_v53, 0.0 }
 0x2cf   : > { %v1135_v61 = vadd.f32 %v2220_v45, %v1134_v60  ;;  %v1198_v0 = vmax.f32 %v1132_v55, 0.0 }
 0x2d0   : > { %v1201_v63 = vmax.f32 %v1143_v59, 0.0 }
 0x2d1   : > { %v1199_v2 = vmax.f32 %v1135_v61, 0.0 }
 0x2d2   : > { %v1221_v56 = vpack.c.bf16 %v1201_v63, %v1200_v62 }
 0x2d3   : > { %v1220_v3 = vpack.c.bf16 %v1199_v2, %v1198_v0  ;;  %v1819_v4 = vpop.f32.mrb[56].mxu0 }
 0x2d4   : > { %v1156_v5 = vadd.f32 %v1819_v4, %v2220_v45  ;;  %v1147_v6 = vpop.f32.mrb[57].mxu0 }
 0x2d5   : > { %v1148_v7 = vadd.f32 %v2220_v45, %v1147_v6  ;;  %v1820_v8 = vpop.f32.mrb[58].mxu0  ;;  %1861 = vmatprep.mubr.bf16.mxu1 %v1220_v3 }
 0x2d6   : > { %v1159_v9 = vadd.f32 %v1820_v8, %v2220_v45  ;;  %v1150_v10 = vpop.f32.mrb[59].mxu0  ;;  %1862 = vmatmul.mubr.bf16.gmra.mrb[48].mxu1 %v1221_v56  ;;  %v1204_v12 = vmax.f32 %v1156_v5, 0.0 }
 0x2d7   : > { %v1151_v11 = vadd.f32 %v2220_v45, %v1150_v10  ;;  %v1202_v14 = vmax.f32 %v1148_v7, 0.0 }
 0x2d8   : > { %v1205_v13 = vmax.f32 %v1159_v9, 0.0 }
 0x2d9   : > { %v1203_v15 = vmax.f32 %v1151_v11, 0.0 }
 0x2da   : > { %v1223_v16 = vpack.c.bf16 %v1205_v13, %v1204_v12 }
 0x2db   : > { %v1222_v17 = vpack.c.bf16 %v1203_v15, %v1202_v14  ;;  %v1823_v18 = vpop.f32.mrb[60].mxu0 }
 0x2dc   : > { %v1172_v19 = vadd.f32 %v1823_v18, %v2220_v45  ;;  %v1163_v20 = vpop.f32.mrb[61].mxu0 }
 0x2dd   : > { %v1164_v21 = vadd.f32 %v2220_v45, %v1163_v20  ;;  %v1824_v22 = vpop.f32.mrb[62].mxu0  ;;  %1865 = vmatprep.mubr.bf16.mxu1 %v1222_v17 }
 0x2de   : > { %v1175_v23 = vadd.f32 %v1824_v22, %v2220_v45  ;;  %v1166_v24 = vpop.f32.mrb[63].mxu0  ;;  %1866 = vmatmul.mubr.bf16.gmra.mrb[52].mxu1 %v1223_v16  ;;  %v1208_v26 = vmax.f32 %v1172_v19, 0.0 }
 0x2df   : > { %v1167_v25 = vadd.f32 %v2220_v45, %v1166_v24  ;;  %v1206_v28 = vmax.f32 %v1164_v21, 0.0 }
 0x2e0   : > { %v1209_v27 = vmax.f32 %v1175_v23, 0.0 }
 0x2e1   : > { %v1207_v29 = vmax.f32 %v1167_v25, 0.0 }
 0x2e2   : > { %v1225_v30 = vpack.c.bf16 %v1209_v27, %v1208_v26 }
 0x2e3   : > { %v1224_v31 = vpack.c.bf16 %v1207_v29, %v1206_v28 }
 0x2e5   : > { %1869 = vmatprep.mubr.bf16.mxu1 %v1224_v31 }
 0x2e6   : > { %1870 = vmatmul.mubr.bf16.gmra.mrb[56].mxu1 %v1225_v30 }
 0x381   : > { %v1843_v45 = vpop.f32.mrb[64].mxu0 }
 0x382   : > { %v1340_v33 = vadd.f32 %v1843_v45, %v2257_v32  ;;  %v1331_v34 = vpop.f32.mrb[65].mxu0 }
 0x383   : > { %v1332_v35 = vadd.f32 %v2257_v32, %v1331_v34  ;;  %v1844_v36 = vpop.f32.mrb[66].mxu0 }
 0x384   : > { %1460 = vst [vmem:[%s2264_s24 + $0x10] sm:$0xff] %v1340_v33  ;;  %v1343_v37 = vadd.f32 %v1844_v36, %v2257_v32  ;;  %v1334_v38 = vpop.f32.mrb[67].mxu0 }
 0x385   : > { %1458 = vst [vmem:[%s2264_s24] sm:$0xff] %v1332_v35  ;;  %v1335_v39 = vadd.f32 %v2257_v32, %v1334_v38 }
 0x386   : > { %1461 = vst [vmem:[%s2264_s24 + $0x18] sm:$0xff] %v1343_v37 }
 0x387   : > { %1459 = vst [vmem:[%s2264_s24 + $0x8] sm:$0xff] %v1335_v39 }
 0x389   : > { %v1847_v40 = vpop.f32.mrb[32].mxu1 }
 0x38a   : > { %v1356_v41 = vadd.f32 %v1847_v40, %v2257_v32  ;;  %v1347_v42 = vpop.f32.mrb[33].mxu1 }
 0x38b   : > { %v1348_v43 = vadd.f32 %v2257_v32, %v1347_v42  ;;  %v1848_v44 = vpop.f32.mrb[34].mxu1 }
 0x38c   : > { %1464 = vst [vmem:[%s2264_s24 + $0x30] sm:$0xff] %v1356_v41  ;;  %v1359_v57 = vadd.f32 %v1848_v44, %v2257_v32  ;;  %v1350_v46 = vpop.f32.mrb[35].mxu1 }
 0x38d   : > { %1462 = vst [vmem:[%s2264_s24 + $0x20] sm:$0xff] %v1348_v43  ;;  %v1351_v47 = vadd.f32 %v2257_v32, %v1350_v46 }
 0x38e   : > { %1465 = vst [vmem:[%s2264_s24 + $0x38] sm:$0xff] %v1359_v57 }
 0x38f   : > { %1463 = vst [vmem:[%s2264_s24 + $0x28] sm:$0xff] %v1351_v47 }
 0x391   : > { %v1851_v48 = vpop.f32.mrb[36].mxu1 }
 0x392   : > { %v1372_v49 = vadd.f32 %v1851_v48, %v2257_v32  ;;  %v1363_v50 = vpop.f32.mrb[37].mxu1 }
 0x393   : > { %v1364_v51 = vadd.f32 %v2257_v32, %v1363_v50  ;;  %v1852_v52 = vpop.f32.mrb[38].mxu1 }
 0x394   : > { %1468 = vst [vmem:[%s2264_s24 + $0x50] sm:$0xff] %v1372_v49  ;;  %v1375_v1 = vadd.f32 %v1852_v52, %v2257_v32  ;;  %v1366_v53 = vpop.f32.mrb[39].mxu1 }
 0x395   : > { %1466 = vst [vmem:[%s2264_s24 + $0x40] sm:$0xff] %v1364_v51  ;;  %v1367_v54 = vadd.f32 %v2257_v32, %v1366_v53 }
 0x396   : > { %1469 = vst [vmem:[%s2264_s24 + $0x58] sm:$0xff] %v1375_v1 }
 0x397   : > { %1467 = vst [vmem:[%s2264_s24 + $0x48] sm:$0xff] %v1367_v54 }
 0x399   : > { %v1855_v55 = vpop.f32.mrb[40].mxu1 }
 0x39a   : > { %v1388_v58 = vadd.f32 %v1855_v55, %v2257_v32  ;;  %v1379_v59 = vpop.f32.mrb[41].mxu1 }
 0x39b   : > { %v1380_v60 = vadd.f32 %v2257_v32, %v1379_v59  ;;  %v1856_v61 = vpop.f32.mrb[42].mxu1 }
 0x39c   : > { %1472 = vst [vmem:[%s2264_s24 + $0x70] sm:$0xff] %v1388_v58  ;;  %v1391_v62 = vadd.f32 %v1856_v61, %v2257_v32  ;;  %v1382_v63 = vpop.f32.mrb[43].mxu1 }
 0x39d   : > { %1470 = vst [vmem:[%s2264_s24 + $0x60] sm:$0xff] %v1380_v60  ;;  %v1383_v0 = vadd.f32 %v2257_v32, %v1382_v63 }
 0x39e   : > { %1473 = vst [vmem:[%s2264_s24 + $0x78] sm:$0xff] %v1391_v62 }
 0x39f   : > { %1471 = vst [vmem:[%s2264_s24 + $0x68] sm:$0xff] %v1383_v0 }
 0x3a1   : > { %v1859_v2 = vpop.f32.mrb[44].mxu1 }
 0x3a2   : > { %v1404_v56 = vadd.f32 %v1859_v2, %v2257_v32  ;;  %v1395_v3 = vpop.f32.mrb[45].mxu1 }
 0x3a3   : > { %v1396_v4 = vadd.f32 %v2257_v32, %v1395_v3  ;;  %v1860_v5 = vpop.f32.mrb[46].mxu1 }
 0x3a4   : > { %1476 = vst [vmem:[%s2264_s24 + $0x90] sm:$0xff] %v1404_v56  ;;  %v1407_v6 = vadd.f32 %v1860_v5, %v2257_v32  ;;  %v1398_v7 = vpop.f32.mrb[47].mxu1 }
 0x3a5   : > { %1474 = vst [vmem:[%s2264_s24 + $0x80] sm:$0xff] %v1396_v4  ;;  %v1399_v8 = vadd.f32 %v2257_v32, %v1398_v7 }
 0x3a6   : > { %1477 = vst [vmem:[%s2264_s24 + $0x98] sm:$0xff] %v1407_v6 }
 0x3a7   : > { %1475 = vst [vmem:[%s2264_s24 + $0x88] sm:$0xff] %v1399_v8 }
 0x3a9   : > { %v1863_v9 = vpop.f32.mrb[48].mxu1 }
 0x3aa   : > { %v1420_v10 = vadd.f32 %v1863_v9, %v2257_v32  ;;  %v1411_v11 = vpop.f32.mrb[49].mxu1 }
 0x3ab   : > { %v1412_v12 = vadd.f32 %v2257_v32, %v1411_v11  ;;  %v1864_v13 = vpop.f32.mrb[50].mxu1 }
 0x3ac   : > { %1480 = vst [vmem:[%s2264_s24 + $0xb0] sm:$0xff] %v1420_v10  ;;  %v1423_v14 = vadd.f32 %v1864_v13, %v2257_v32  ;;  %v1414_v15 = vpop.f32.mrb[51].mxu1 }
 0x3ad   : > { %1478 = vst [vmem:[%s2264_s24 + $0xa0] sm:$0xff] %v1412_v12  ;;  %v1415_v16 = vadd.f32 %v2257_v32, %v1414_v15 }
 0x3ae   : > { %1481 = vst [vmem:[%s2264_s24 + $0xb8] sm:$0xff] %v1423_v14 }
 0x3af   : > { %1479 = vst [vmem:[%s2264_s24 + $0xa8] sm:$0xff] %v1415_v16 }
 0x3b1   : > { %v1867_v17 = vpop.f32.mrb[52].mxu1 }
 0x3b2   : > { %v1436_v18 = vadd.f32 %v1867_v17, %v2257_v32  ;;  %v1427_v19 = vpop.f32.mrb[53].mxu1 }
 0x3b3   : > { %v1428_v20 = vadd.f32 %v2257_v32, %v1427_v19  ;;  %v1868_v21 = vpop.f32.mrb[54].mxu1 }
 0x3b4   : > { %1484 = vst [vmem:[%s2264_s24 + $0xd0] sm:$0xff] %v1436_v18  ;;  %v1439_v22 = vadd.f32 %v1868_v21, %v2257_v32  ;;  %v1430_v23 = vpop.f32.mrb[55].mxu1 }
 0x3b5   : > { %1482 = vst [vmem:[%s2264_s24 + $0xc0] sm:$0xff] %v1428_v20  ;;  %v1431_v24 = vadd.f32 %v2257_v32, %v1430_v23 }
 0x3b6   : > { %1485 = vst [vmem:[%s2264_s24 + $0xd8] sm:$0xff] %v1439_v22 }
 0x3b7   : > { %1483 = vst [vmem:[%s2264_s24 + $0xc8] sm:$0xff] %v1431_v24 }
 0x3b9   : > { %v1871_v25 = vpop.f32.mrb[56].mxu1 }
 0x3ba   : > { %v1452_v26 = vadd.f32 %v1871_v25, %v2257_v32  ;;  %v1443_v27 = vpop.f32.mrb[57].mxu1 }
 0x3bb   : > { %v1444_v28 = vadd.f32 %v2257_v32, %v1443_v27  ;;  %v1872_v29 = vpop.f32.mrb[58].mxu1 }
 0x3bc   : > { %1488 = vst [vmem:[%s2264_s24 + $0xf0] sm:$0xff] %v1452_v26  ;;  %v1455_v30 = vadd.f32 %v1872_v29, %v2257_v32  ;;  %v1446_v31 = vpop.f32.mrb[59].mxu1 }
 0x3bd   : > { %1486 = vst [vmem:[%s2264_s24 + $0xe0] sm:$0xff] %v1444_v28  ;;  %v1447_v45 = vadd.f32 %v2257_v32, %v1446_v31 }
 0x3be   : > { %1489 = vst [vmem:[%s2264_s24 + $0xf8] sm:$0xff] %v1455_v30 }
 0x3bf   : > { %1487 = vst [vmem:[%s2264_s24 + $0xe8] sm:$0xff] %v1447_v45 }
 0x3c0 PF: > { %s19_s30 = sadd.s32 1, %s1929_s30  }
 0x3c1   : > { %p16_p4 = scmp.ge.s32.totalorder %s19_s30, 4  }
 0x3c3   :  { %18 = sbr.rel (!%p16_p4) target bundleno = 1 (0x1), region = 86 }

</bundles_post_ra>
